<compile_context>
chip_gen: v7x
topology: tpu7x:2x2x1
jax: 0.10.0
libtpu: 0.0.40
codegen_flags: <defaults>
</compile_context>

<pallas_src>
import jax
import jax.numpy as jnp
from jax import lax
from jax.experimental import pallas as pl
from jax.experimental.pallas import tpu as pltpu


# ----------------------------------------------------------------------------- kernel

def _make_proj_kernel(num_proj, heads_per_block, head_dim):
    """Kernel computing `num_proj` linear projections of one activation tile.

    refs layout: (x_ref, w_ref, out_0..out_{P-1}, acc_0..acc_{P-1})
      x_ref : (tm, tk)                        activation tile (compute dtype)
      w_ref : (P, tn, tk)                     stacked weights, torch (out, in) layout
      out_p : (heads_per_block, tm, head_dim) slab of the (B, nh, S, hd) output
      acc_p : (tm, tn) f32                    VMEM accumulator
    """

    def kernel(x_ref, w_ref, *refs):
        outs = refs[:num_proj]
        accs = refs[num_proj:]
        k = pl.program_id(3)
        last_k = pl.num_programs(3) - 1
        x = x_ref[...]

        for p in range(num_proj):
            # y = x @ W^T : contract the `in` axis of both operands on the MXU
            # (native transposed-RHS matmul, same lowering as q @ k.T).
            part = lax.dot_general(
                x,
                w_ref[p],
                dimension_numbers=(((1,), (1,)), ((), ())),
                preferred_element_type=jnp.float32,
            )

            @pl.when(k == 0)
            def _(p=p, part=part):
                accs[p][...] = part            # init with first partial product

            @pl.when(k > 0)
            def _(p=p, part=part):
                accs[p][...] += part

        @pl.when(k == last_k)
        def _():
            for p in range(num_proj):
                acc = accs[p][...]
                for h in range(heads_per_block):
                    # 128-lane-aligned static slices -> direct (B, nh, S, hd) layout;
                    # no post-kernel reshape/transpose pass over HBM.
                    outs[p][h, :, :] = acc[
                        :, h * head_dim:(h + 1) * head_dim
                    ].astype(outs[p].dtype)

    return kernel


# ----------------------------------------------------------------------------- wrapper

def _pick_tile(extent, candidates):
    for c in candidates:
        if c <= extent and extent % c == 0:
            return c
    return extent  # full-extent block is always legal


def _select_tiles(S, H, P, n_heads, head_dim, compute_itemsize, out_itemsize,
                  vmem_budget=20 * 1024 * 1024):
    """Pick (tm, tk, heads_per_block) so the double-buffered working set stays
    within `vmem_budget` (safe even on v7x's smaller VMEM)."""
    heads_per_block = next(h for h in (4, 2, 1) if n_heads % h == 0)
    tn = heads_per_block * head_dim

    # Bigger seq tile -> fewer weight re-reads from HBM (weights are re-streamed
    # once per seq tile per batch).
    tm = _pick_tile(S, (512, 256, 128, 64, 32, 16, 8))

    # Grow the reduction tile as long as the footprint fits the budget.
    tk = _pick_tile(H, (128,))
    for cand in (H, 4096, 2048, 1024, 512, 256, 128):
        if cand > H or H % cand != 0:
            continue
        x_bytes = 2 * tm * cand * compute_itemsize            # double-buffered
        w_bytes = 2 * P * tn * cand * compute_itemsize        # double-buffered
        acc_bytes = P * tm * tn * 4
        out_bytes = 2 * P * heads_per_block * tm * head_dim * out_itemsize
        if x_bytes + w_bytes + acc_bytes + out_bytes <= vmem_budget:
            tk = cand
            break
    return tm, tk, heads_per_block, tn


def fused_head_proj(x, w_stack, n_heads, head_dim, *, out_dtype=None):
    """Compute P = w_stack.shape[0] projections of x, each emitted directly as
    (B, n_heads, S, head_dim).

    x       : (B, S, H)
    w_stack : (P, n_heads*head_dim, H) in torch.nn.Linear (out, in) layout
    """
    B, S, H = x.shape
    P, N, K = w_stack.shape
    assert K == H and N == n_heads * head_dim

    compute_dtype = w_stack.dtype          # weights pre-cast at load time (bf16)
    out_dtype = out_dtype or x.dtype
    x_c = x if x.dtype == compute_dtype else x.astype(compute_dtype)

    tm, tk, heads_per_block, tn = _select_tiles(
        S, H, P, n_heads, head_dim,
        jnp.dtype(compute_dtype).itemsize, jnp.dtype(out_dtype).itemsize)

    grid = (B, S // tm, n_heads // heads_per_block, H // tk)
    kernel = _make_proj_kernel(P, heads_per_block, head_dim)

    out_shape = tuple(
        jax.ShapeDtypeStruct((B, n_heads, S, head_dim), out_dtype)
        for _ in range(P))
    out_specs = tuple(
        pl.BlockSpec((None, heads_per_block, tm, head_dim),
                     lambda b, i, j, k: (b, j, i, 0))
        for _ in range(P))

    res = pl.pallas_call(
        kernel,
        out_shape=out_shape,
        grid_spec=pltpu.PrefetchScalarGridSpec(
            num_scalar_prefetch=0,
            grid=grid,
            in_specs=[
                # activation tile (batch dim squeezed)
                pl.BlockSpec((None, tm, tk), lambda b, i, j, k: (b, i, k)),
                # stacked weights streamed in native (out, in) layout — no transpose
                pl.BlockSpec((P, tn, tk), lambda b, i, j, k: (0, j, k)),
            ],
            out_specs=out_specs,
            scratch_shapes=[pltpu.VMEM((tm, tn), jnp.float32) for _ in range(P)],
        ),
        compiler_params=pltpu.CompilerParams(
            dimension_semantics=("parallel", "parallel", "parallel", "arbitrary"),
            vmem_limit_bytes=32 * 1024 * 1024,
        ),
    )(x_c, w_stack)

    if not isinstance(res, (tuple, list)):
        res = (res,)
    return tuple(res)


def prepare_qkv_weights(wq, wk, wv, compute_dtype=jnp.bfloat16):
    """One-time, parameter-load-time weight prep (NOT per forward):
    keep torch (out, in) layout (no transpose), cast to the MXU compute dtype,
    and stack K/V so one pallas_call streams memory_states a single time."""
    wq_p = wq.astype(compute_dtype)[None]                       # (1, H, H)
    wkv_p = jnp.stack([wk, wv], axis=0).astype(compute_dtype)   # (2, H, H)
    return wq_p, wkv_p


def cross_attn_qkv_proj(hidden_states, memory_states, wq_p, wkv_p,
                        n_heads=32, head_dim=128):
    """Forward pass of CrossAttnQKVProj. Returns (query, key, value),
    each shaped (B, n_heads, S, head_dim)."""
    (query,) = fused_head_proj(hidden_states, wq_p, n_heads, head_dim)
    key, value = fused_head_proj(memory_states, wkv_p, n_heads, head_dim)
    return query, key, value


# ----------------------------------------------------------------------------- demo

if __name__ == "__main__":
    # Small shapes consistent with the module (real: H=4096, nh=32, hd=128).
    B, Sq, Skv = 2, 8, 16
    n_heads, head_dim = 4, 128
    H = n_heads * head_dim  # 512
    dtype = jnp.bfloat16    # LLaMA layers typically run in bf16

    root = jax.random.PRNGKey(0)
    k1, k2, k3, k4, k5 = jax.random.split(root, 5)
    hidden_states = jax.random.normal(k1, (B, Sq, H), dtype=jnp.float32).astype(dtype)
    memory_states = jax.random.normal(k2, (B, Skv, H), dtype=jnp.float32).astype(dtype)
    wq = (jax.random.normal(k3, (H, H), dtype=jnp.float32) * 0.02).astype(dtype)
    wk = (jax.random.normal(k4, (H, H), dtype=jnp.float32) * 0.02).astype(dtype)
    wv = (jax.random.normal(k5, (H, H), dtype=jnp.float32) * 0.02).astype(dtype)

    # One-time weight preparation (parameter-load time).
    wq_p, wkv_p = prepare_qkv_weights(wq, wk, wv, compute_dtype=dtype)

    q, k, v = cross_attn_qkv_proj(hidden_states, memory_states, wq_p, wkv_p,
                                  n_heads, head_dim)
    jax.block_until_ready((q, k, v))

    # Reference (bf16 operands, f32 accumulation — same numerics as the MXU path).
    def ref_proj(x, w, S):
        y = jnp.einsum("bsh,oh->bso",
                       x.astype(jnp.float32), w.astype(jnp.float32))
        y = y.reshape(B, S, n_heads, head_dim).transpose(0, 2, 1, 3)
        return y.astype(dtype)

    rq = ref_proj(hidden_states, wq, Sq)
    rk = ref_proj(memory_states, wk, Skv)
    rv = ref_proj(memory_states, wv, Skv)

    assert q.shape == (B, n_heads, Sq, head_dim)
    assert k.shape == (B, n_heads, Skv, head_dim)
    assert v.shape == (B, n_heads, Skv, head_dim)

    def close(a, b):
        return jnp.allclose(a.astype(jnp.float32), b.astype(jnp.float32),
                            atol=2e-2, rtol=2e-2)

    assert close(q, rq), "query mismatch"
    assert close(k, rk), "key mismatch"
    assert close(v, rv), "value mismatch"

    print("KERNEL_OK")
</pallas_src>

<mosaic_0001>
module attributes {stable_mosaic.version = 11 : i64} {
  func.func @kernel(%arg0: i32, %arg1: i32, %arg2: i32, %arg3: i32, %arg4: memref<1x8x512xbf16, #tpu.memory_space<vmem>>, %arg5: memref<1x512x512xbf16, #tpu.memory_space<vmem>>, %arg6: memref<1x4x8x128xbf16, #tpu.memory_space<vmem>>, %arg7: memref<8x512xf32, #tpu.memory_space<vmem>>) attributes {dimension_semantics = [#tpu.dimension_semantics<parallel>, #tpu.dimension_semantics<parallel>, #tpu.dimension_semantics<parallel>, #tpu.dimension_semantics<arbitrary>], iteration_bounds = array<i64: 2, 1, 1, 1>, scalar_prefetch = 0 : i64, scratch_operands = 1 : i64, tpu.core_type = #tpu.core_type<tc>, window_params = [{transform_indices = @transform_0, window_bounds = array<i64: 1, 8, 512>}, {transform_indices = @transform_1, window_bounds = array<i64: 1, 512, 512>}, {transform_indices = @transform_2, window_bounds = array<i64: 1, 4, 8, 128>}]} {
    %c0 = arith.constant 0 : index
    %c0_0 = arith.constant 0 : index
    %c0_1 = arith.constant 0 : index
    %0 = vector.load %arg4[%c0, %c0_0, %c0_1] : memref<1x8x512xbf16, #tpu.memory_space<vmem>>, vector<1x8x512xbf16>
    %1 = vector.shape_cast %0 : vector<1x8x512xbf16> to vector<8x512xbf16>
    %c0_2 = arith.constant 0 : index
    %c0_3 = arith.constant 0 : index
    %c0_4 = arith.constant 0 : index
    %2 = vector.load %arg5[%c0_2, %c0_3, %c0_4] : memref<1x512x512xbf16, #tpu.memory_space<vmem>>, vector<1x512x512xbf16>
    %3 = vector.shape_cast %2 : vector<1x512x512xbf16> to vector<512x512xbf16>
    %cst = arith.constant dense<0.000000e+00> : vector<8x512xf32>
    %4 = tpu.matmul %1, %3, %cst {dimension_numbers = #tpu.dot_dimension_numbers<[1], [1], [0], [0], [0, 0, 1, 0], [], []>} : vector<8x512xbf16>, vector<512x512xbf16>, vector<8x512xf32> -> vector<8x512xf32>
    %c0_i32 = arith.constant 0 : i32
    %5 = arith.cmpi eq, %arg3, %c0_i32 : i32
    %6 = arith.extui %5 : i1 to i32
    %c0_i32_5 = arith.constant 0 : i32
    %7 = arith.cmpi ne, %6, %c0_i32_5 : i32
    scf.if %7 {
      %c0_10 = arith.constant 0 : index
      %c0_11 = arith.constant 0 : index
      %14 = vector.load %arg7[%c0_10, %c0_11] : memref<8x512xf32, #tpu.memory_space<vmem>>, vector<8x512xf32>
      tpu.vector_store %arg7[%c0_10, %c0_11], %4 {strides = array<i32>} : memref<8x512xf32, #tpu.memory_space<vmem>>, vector<8x512xf32>,
    } else {
    }
    %c0_i32_6 = arith.constant 0 : i32
    %8 = arith.cmpi sgt, %arg3, %c0_i32_6 : i32
    %9 = arith.extui %8 : i1 to i32
    %c0_i32_7 = arith.constant 0 : i32
    %10 = arith.cmpi ne, %9, %c0_i32_7 : i32
    scf.if %10 {
      %c0_10 = arith.constant 0 : index
      %c0_11 = arith.constant 0 : index
      %14 = vector.load %arg7[%c0_10, %c0_11] : memref<8x512xf32, #tpu.memory_space<vmem>>, vector<8x512xf32>
      %15 = arith.addf %14, %4 : vector<8x512xf32>
      %c0_12 = arith.constant 0 : index
      %c0_13 = arith.constant 0 : index
      %16 = vector.load %arg7[%c0_12, %c0_13] : memref<8x512xf32, #tpu.memory_space<vmem>>, vector<8x512xf32>
      tpu.vector_store %arg7[%c0_12, %c0_13], %15 {strides = array<i32>} : memref<8x512xf32, #tpu.memory_space<vmem>>, vector<8x512xf32>,
    } else {
    }
    %c0_i32_8 = arith.constant 0 : i32
    %11 = arith.cmpi eq, %arg3, %c0_i32_8 : i32
    %12 = arith.extui %11 : i1 to i32
    %c0_i32_9 = arith.constant 0 : i32
    %13 = arith.cmpi ne, %12, %c0_i32_9 : i32
    scf.if %13 {
      %c0_10 = arith.constant 0 : index
      %c0_11 = arith.constant 0 : index
      %14 = vector.load %arg7[%c0_10, %c0_11] : memref<8x512xf32, #tpu.memory_space<vmem>>, vector<8x512xf32>
      %15 = vector.extract_strided_slice %14 {offsets = [0, 0], sizes = [8, 128], strides = [1, 1]} : vector<8x512xf32> to vector<8x128xf32>
      %16 = arith.truncf %15 : vector<8x128xf32> to vector<8x128xbf16>
      %c0_12 = arith.constant 0 : index
      %c0_13 = arith.constant 0 : index
      %c0_14 = arith.constant 0 : index
      %c0_15 = arith.constant 0 : index
      %17 = vector.load %arg6[%c0_12, %c0_13, %c0_14, %c0_15] : memref<1x4x8x128xbf16, #tpu.memory_space<vmem>>, vector<1x1x8x128xbf16>
      %18 = vector.shape_cast %17 : vector<1x1x8x128xbf16> to vector<8x128xbf16>
      %19 = vector.shape_cast %16 : vector<8x128xbf16> to vector<1x1x8x128xbf16>
      tpu.vector_store %arg6[%c0_12, %c0_13, %c0_14, %c0_15], %19 {strides = array<i32>} : memref<1x4x8x128xbf16, #tpu.memory_space<vmem>>, vector<1x1x8x128xbf16>,
      %20 = vector.extract_strided_slice %14 {offsets = [0, 128], sizes = [8, 128], strides = [1, 1]} : vector<8x512xf32> to vector<8x128xf32>
      %21 = arith.truncf %20 : vector<8x128xf32> to vector<8x128xbf16>
      %c0_16 = arith.constant 0 : index
      %c1 = arith.constant 1 : index
      %c0_17 = arith.constant 0 : index
      %c0_18 = arith.constant 0 : index
      %22 = vector.load %arg6[%c0_16, %c1, %c0_17, %c0_18] : memref<1x4x8x128xbf16, #tpu.memory_space<vmem>>, vector<1x1x8x128xbf16>
      %23 = vector.shape_cast %22 : vector<1x1x8x128xbf16> to vector<8x128xbf16>
      %24 = vector.shape_cast %21 : vector<8x128xbf16> to vector<1x1x8x128xbf16>
      tpu.vector_store %arg6[%c0_16, %c1, %c0_17, %c0_18], %24 {strides = array<i32>} : memref<1x4x8x128xbf16, #tpu.memory_space<vmem>>, vector<1x1x8x128xbf16>,
      %25 = vector.extract_strided_slice %14 {offsets = [0, 256], sizes = [8, 128], strides = [1, 1]} : vector<8x512xf32> to vector<8x128xf32>
      %26 = arith.truncf %25 : vector<8x128xf32> to vector<8x128xbf16>
      %c0_19 = arith.constant 0 : index
      %c2 = arith.constant 2 : index
      %c0_20 = arith.constant 0 : index
      %c0_21 = arith.constant 0 : index
      %27 = vector.load %arg6[%c0_19, %c2, %c0_20, %c0_21] : memref<1x4x8x128xbf16, #tpu.memory_space<vmem>>, vector<1x1x8x128xbf16>
      %28 = vector.shape_cast %27 : vector<1x1x8x128xbf16> to vector<8x128xbf16>
      %29 = vector.shape_cast %26 : vector<8x128xbf16> to vector<1x1x8x128xbf16>
      tpu.vector_store %arg6[%c0_19, %c2, %c0_20, %c0_21], %29 {strides = array<i32>} : memref<1x4x8x128xbf16, #tpu.memory_space<vmem>>, vector<1x1x8x128xbf16>,
      %30 = vector.extract_strided_slice %14 {offsets = [0, 384], sizes = [8, 128], strides = [1, 1]} : vector<8x512xf32> to vector<8x128xf32>
      %31 = arith.truncf %30 : vector<8x128xf32> to vector<8x128xbf16>
      %c0_22 = arith.constant 0 : index
      %c3 = arith.constant 3 : index
      %c0_23 = arith.constant 0 : index
      %c0_24 = arith.constant 0 : index
      %32 = vector.load %arg6[%c0_22, %c3, %c0_23, %c0_24] : memref<1x4x8x128xbf16, #tpu.memory_space<vmem>>, vector<1x1x8x128xbf16>
      %33 = vector.shape_cast %32 : vector<1x1x8x128xbf16> to vector<8x128xbf16>
      %34 = vector.shape_cast %31 : vector<8x128xbf16> to vector<1x1x8x128xbf16>
      tpu.vector_store %arg6[%c0_22, %c3, %c0_23, %c0_24], %34 {strides = array<i32>} : memref<1x4x8x128xbf16, #tpu.memory_space<vmem>>, vector<1x1x8x128xbf16>,
    } else {
    }
    return
  }
  func.func @transform_0(%arg0: i32, %arg1: i32, %arg2: i32, %arg3: i32) -> (i32, i32, i32) {
    %c0_i32 = arith.constant 0 : i32
    return %arg0, %arg1, %arg3 : i32, i32, i32
  }
  func.func @transform_1(%arg0: i32, %arg1: i32, %arg2: i32, %arg3: i32) -> (i32, i32, i32) {
    %c0_i32 = arith.constant 0 : i32
    %c0_i32_0 = arith.constant 0 : i32
    return %c0_i32, %arg2, %arg3 : i32, i32, i32
  }
  func.func @transform_2(%arg0: i32, %arg1: i32, %arg2: i32, %arg3: i32) -> (i32, i32, i32, i32) {
    %c0_i32 = arith.constant 0 : i32
    %c0_i32_0 = arith.constant 0 : i32
    return %arg0, %arg2, %arg1, %c0_i32 : i32, i32, i32, i32
  }
}

</mosaic_0001>

<bundles_post_ra>
// kernel: tpu_custom_call.1
= control target key start
LH: loop header
LB: loop body
LE: loop exit
PB: predicated region body
PF: predicated region fallthrough
CT: control target
= control target key end

     0   :  { %7 = vsyncpa [#allocation4], 0  ;;  %s2198_s0 = inlined_call_operand.hbm [shape: bf16[2,8,512], index: 0, kind: input, shape index: {}]   ;;  %s2199_s1 = inlined_call_operand.hbm [shape: bf16[1,512,512], index: 1, kind: input, shape index: {}]   ;;  %s2200_s2 = inlined_call_operand.hbm [shape: bf16[2,4,8,128], index: 2, kind: output, shape index: {}]  }
   0x1   :  { %9 = vsyncpa [#allocation4 + $0x1], 0 }
   0x2   :  { %10 = vsyncpa [#allocation7], 0 }
   0x3   :  { %11 = vsyncpa [#allocation5], 0 }
   0x4   :  { %13 = vsyncpa [#allocation5 + $0x1], 0  ;;  %s1962_s9 = smov 0   ;;  %s1964_s10 = smov 0  }
   0x5   :  { %s1966_s11 = smov 0   ;;  %s1968_s12 = smov 0  }
   0x6   :  { %s1970_s13 = smov 0   ;;  %s1972_s14 = smov 0  }
   0x7 LB: > { %s1348_s15 = sadd.s32 4294967295, %s1938_s14   ;;  %s1349_s16 = sadd.s32 4294967294, %s1938_s14   ;;  %s1938_s14 = sphi %s1972_s14, %s19_s14   ;;  %s1934_s13 = sphi %s1970_s13, %s2224_s13   ;;  %s1930_s12 = sphi %s1968_s12, %s2223_s12   ;;  %s1926_s11 = sphi %s1966_s11, %s2222_s11   ;;  %s1922_s10 = sphi %s1964_s10, %s2221_s10   ;;  %s1918_s9 = sphi %s1962_s9, %s2220_s9  }
   0x8   : > { %p69_p0 = scmp.ne.s32.totalorder %s1922_s10, %s1918_s9  ;;  %p1996_p1 = scmp.eq.s32.totalorder %s1348_s15, 0 }
   0x9   : > { %p2000_p2 = scmp.eq.s32.totalorder %s1348_s15, 1  ;;  %p131_p3 = scmp.eq.s32.totalorder %s1349_s16, 1 }
   0xa   : > { %s2205_s17 = scalar_select %p1996_p1, 1, 0 }
   0xb   : > { %s2206_s18 = scalar_select %p2000_p2, 1, 0 }
   0xc   : > { %p2006_p4 = por %p1996_p1, %p69_p0  ;;  %p1350_p5 = scmp.ge.s32.totalorder %s1938_s14, 1 }
   0xd   : > { %p2011_p6 = por %p131_p3, %p69_p0  ;;  %p138_p7 = scmp.lt.s32.totalorder %s1938_s14, 3 }
   0xe   : > { %s2207_s19 = scalar_select %p2006_p4, 1, 0 }
   0xf   : > { %s2208_s20 = scalar_select %p2011_p6, 1, 0 }
  0x10   : > { %p2016_p8 = pnand %p1350_p5, %p138_p7  ;;  %s1940_s22 = smov [#allocation6]  }
  0x11   : > { %s156_s23 = sshll.u32 %s1940_s22, 4  ;;  %s45_s25 = sadd.s32 1, %s1934_s13  ;;  %s157_s23 = int_to_ptr.vmem [resolvable:$true] %s156_s23 }
  0x12   : > { %s2209_s21 = scalar_select %p2016_p8, 1, 0 }
  0x13   : > { %p1529_p9 = pneg %p2016_p8  ;;  %s1794_s28 = scalar_lea.hbm %s2199_s1, 16384 }
  0x14   : > { %p1795_p12 = scmp.ne.s32.totalorder %s2199_s1, %s1794_s28  ;;  %p1801_p5 = scmp.lt.u32.totalorder %s1794_s28, %s2199_s1 }
  0x15   : > { %p2025_p11 = pnand %p1529_p9, %p1996_p1 }
  0x17   : > { %p1796_p13 = pneg %p2025_p11 }
  0x19   : > { %p1797_p0 = pnand %p1796_p13, %p1795_p12 }
  0x1b   : > { %p1798_p3 = pneg %p1797_p0 }
  0x1d   : > { %p1803_p7 = pnand %p1801_p5, %p1798_p3 }
  0x1f   : > { %1806 = shalt.err (!%p1803_p7)
}
  0x20   : > { %s1807_s5 = scalar_lea.vmem %s157_s23, 16384  ;;  %p1815_p1 = scmp.lt.s32.totalorder %s157_s23, %s157_s23 }
  0x21   : > { %p1808_p9 = scmp.ne.s32.totalorder %s157_s23, %s1807_s5  ;;  %p1816_p4 = scmp.lt.s32.totalorder %s1807_s5, %s1807_s5 }
  0x23   : > { %p1810_p10 = pnand %p1808_p9, %p1796_p13  ;;  %p1817_p8 = por %p1816_p4, %p1815_p1 }
  0x25   : > { %p1811_p6 = pneg %p1810_p10 }
  0x27   : > { %p1818_p2 = pnand %p1817_p8, %p1811_p6 }
  0x29   : > { %1821 = shalt.err (!%p1818_p2)
}
  0x2a   : > { %s1941_s6 = smov 256   ;;  %s1942_s7 = smov 16  }
  0x2b   : > { %1532 = dma.hbm_to_vmem [thread:$0]  (!%p2025_p11), %s2199_s1, 16384, %s157_s23, [#allocation7], %s1941_s6, %s1941_s6, %s1942_s7  }
  0x2c   : > { %p47_p1 = scmp.ge.s32.totalorder %s45_s25, 2  ;;  %s56_s16 = sadd.s32 1, %s1926_s11 }
  0x2d   : > { %p63_p2 = scmp.ne.s32.totalorder %s1926_s11, %s1922_s10  ;;  %p64_p4 = scmp.eq.s32.totalorder %s1938_s14, 0 }
  0x2e   : > { %s2226_s25 = smov (%p47_p1, %s45_s25), 0  ;;  %p2212_p8 = scmp.ne.s32.totalorder %s2206_s18, 0 }
  0x2f   : > { %p2052_p6 = por %p64_p4, %p63_p2  ;;  %s49_s24 = ssub.s32 %s1934_s13, %s2226_s25 }
  0x30   : > { %p2058_p10 = por %p2212_p8, %p63_p2  ;;  %p1542_p12 = scmp.lt.s32.totalorder %s1938_s14, 2 }
  0x31   : > { %p54_p11 = scmp.eq.s32.totalorder %s49_s24, 0  ;;  %s170_s23 = sand.u32 1, %s1926_s11  }
  0x32   : > { %s1353_s27 = sshll.u32 %s170_s23, 4  ;;  %s1500_s29 = sshll.u32 %s1934_s13, 8 }
  0x33   : > { %s2067_s28 = scalar_select %p54_p11, %s1926_s11, %s56_s16  }
  0x34   : > { %s2073_s4 = scalar_lea.hbm %s2198_s0, %s1500_s29  ;;  %s174_s18 = scalar_lea.vmem [#allocation3], %s1353_s27 }
  0x35   : > { %s186_s5 = sshll.u32 %s174_s18, 4  ;;  %p2079_p13 = pnand %p1542_p12, %p2052_p6  ;;  %s2075_s5 = int_to_ptr.vmem [resolvable:$true] %s186_s5 }
  0x36   : > { %s171_s7 = scalar_lea.sflag [#allocation4], %s170_s23  ;;  %s1822_s8 = scalar_lea.hbm %s2073_s4, 256 }
  0x37   : > { %p1823_p0 = scmp.ne.s32.totalorder %s2073_s4, %s1822_s8  ;;  %p1824_p3 = pneg %p2079_p13 }
  0x38   : > { %s1827_s24 = scalar_lea.hbm %s2198_s0, 512  ;;  %p1828_p9 = scmp.lt.u32.totalorder %s2073_s4, %s2198_s0 }
  0x39   : > { %p1825_p5 = pnand %p1824_p3, %p1823_p0  ;;  %p1829_p1 = scmp.lt.u32.totalorder %s1827_s24, %s1822_s8 }
  0x3a   : > { %p1831_p4 = scmp.lt.u32.totalorder %s1822_s8, %s2073_s4 }
  0x3b   : > { %p1826_p7 = pneg %p1825_p5  ;;  %p1830_p2 = por %p1829_p1, %p1828_p9 }
  0x3d   : > { %p1832_p6 = por %p1831_p4, %p1830_p2 }
  0x3f   : > { %p1833_p8 = pnand %p1832_p6, %p1826_p7 }
  0x41   : > { %1836 = shalt.err (!%p1833_p8)
}
  0x42   : > { %s1837_s23 = scalar_lea.vmem %s2075_s5, 256  ;;  %s1943_s29 = smov [#allocation3]  }
  0x43   : > { %p1838_p12 = scmp.ne.s32.totalorder %s2075_s5, %s1837_s23  ;;  %s1842_s30 = sshll.u32 %s1943_s29, 4  ;;  %s1843_s30 = int_to_ptr.vmem [resolvable:$false] %s1842_s30 }
  0x44   : > { %s1844_s3 = scalar_lea.vmem %s1843_s30, 512  ;;  %p1845_p5 = scmp.lt.s32.totalorder %s2075_s5, %s1843_s30 }
  0x45   : > { %p1840_p11 = pnand %p1838_p12, %p1824_p3  ;;  %p1846_p9 = scmp.lt.s32.totalorder %s1844_s3, %s1837_s23 }
  0x47   : > { %p1841_p0 = pneg %p1840_p11  ;;  %p1847_p1 = por %p1846_p9, %p1845_p5 }
  0x49   : > { %p1848_p2 = pnand %p1847_p1, %p1841_p0 }
  0x4b   : > { %1851 = shalt.err (!%p1848_p2)
}
  0x4c   : > { %1536 = dma.hbm_to_vmem [thread:$0]  (!%p2079_p13), %s2073_s4, 256, %s2075_s5, %s171_s7  }
  0x4d   : > { %p2215_p7 = scmp.ne.s32.totalorder %s2209_s21, 0 }
  0x4e   : > { %s2111_s18 = sand.u32 (!%p2215_p7), 1, %s1922_s10   ;;  %p2216_p3 = scmp.ne.s32.totalorder (!%p2215_p7), %s2207_s19, 0 }
  0x4f   : > { %195 = sbr.rel (%p2215_p7) target bundleno = 578 (0x242), region = 28  ;;  %s1357_s8 = sshll.u32 (!%p2215_p7), %s2111_s18, 4 }
  0x50   : > { %s198_s15 = scalar_lea.sflag (!%p2215_p7), [#allocation4], %s2111_s18  ;;  %s2117_s16 = scalar_lea.vmem (!%p2215_p7), [#allocation3], %s1357_s8 }
  0x56   : > { %1905 = dma.done.wait (%p2216_p3), %s198_s15, 256  }
  0x57   : > { %1907 = vsyncadd (%p2216_p3), %s198_s15, 4294967040  ;;  %p2217_p13 = scmp.ne.s32.totalorder %s2205_s17, 0 }
  0x59   : > { %1909 = dma.done.wait (%p2217_p13), [#allocation7], 16384  }
  0x5a   : > { %1911 = vsyncadd (%p2217_p13), [#allocation7], 4294950912  ;;  %v1598_v0 = vld [vmem:[#allocation6 + $0x4] ss:$16 sps:$4 sm:$0xff]   ;;  %v1602_v2 = vld [vmem:[#allocation6] ss:$16 sps:$4 sm:$0xff]  }
  0x5b   : > { %v1600_v1 = vld [vmem:[#allocation6 + $0x204] ss:$16 sps:$4 sm:$0xff]   ;;  %1014 = vmatprep.subr.bf16.mxu0 %v1598_v0  ;;  %v1603_v3 = vld [vmem:[#allocation6 + $0x200] ss:$16 sps:$4 sm:$0xff]   ;;  %s225_s17 = scalar_lea.vmem [#allocation8], %s1357_s8  ;;  %s1501_s21 = sshll.u32 %s1930_s12, 8 }
  0x5c   : > { %1096 = vmatprep.subr.bf16.mxu1 %v1600_v1  ;;  %v1604_v4 = vld [vmem:[#allocation6 + $0x24] ss:$16 sps:$4 sm:$0xff]   ;;  %1015 = vmatpush1.bf16.xpose.msra.mxu0 %v1602_v2  ;;  %v1608_v6 = vld [vmem:[#allocation6 + $0x20] ss:$16 sps:$4 sm:$0xff]   ;;  %v1698_v2 = vld [vmem:[#allocation6 + $0xc] ss:$16 sps:$4 sm:$0xff]   ;;  %s2149_s6 = scalar_lea.hbm %s2200_s2, %s1501_s21 }
  0x5d   : > { %1097 = vmatpush1.bf16.xpose.msra.mxu1 %v1603_v3  ;;  %v1606_v5 = vld [vmem:[#allocation6 + $0x224] ss:$16 sps:$4 sm:$0xff]   ;;  %1016 = vmatprep.subr.bf16.mxu0 %v1604_v4  ;;  %v1609_v7 = vld [vmem:[#allocation6 + $0x220] ss:$16 sps:$4 sm:$0xff]   ;;  %v1701_v3 = vld [vmem:[#allocation6 + $0x20c] ss:$16 sps:$4 sm:$0xff]  }
  0x5e   : > { %1098 = vmatprep.subr.bf16.mxu1 %v1606_v5  ;;  %v1610_v8 = vld [vmem:[#allocation6 + $0x44] ss:$16 sps:$4 sm:$0xff]   ;;  %v1614_v10 = vld [vmem:[#allocation6 + $0x40] ss:$16 sps:$4 sm:$0xff]   ;;  %v2135_v5 = vld [vmem:[%s2117_s16 + $0x8] sm:$0xff]  ;;  %s1237_s19 = sshll.u32 %s225_s17, 4  ;;  %s2144_s19 = int_to_ptr.vmem [resolvable:$true] %s1237_s19 }
  0x5f   : > { %v1612_v9 = vld [vmem:[#allocation6 + $0x244] ss:$16 sps:$4 sm:$0xff]   ;;  %v1615_v11 = vld [vmem:[#allocation6 + $0x240] ss:$16 sps:$4 sm:$0xff]   ;;  %s1221_s12 = scalar_lea.sflag [#allocation5], %s2111_s18  ;;  %s1852_s7 = scalar_lea.vmem %s2144_s19, 256 }
  0x60   : > { %v1616_v12 = vld [vmem:[#allocation6 + $0x64] ss:$16 sps:$4 sm:$0xff]   ;;  %v1620_v14 = vld [vmem:[#allocation6 + $0x60] ss:$16 sps:$4 sm:$0xff]   ;;  %p1853_p4 = scmp.ne.s32.totalorder %s2144_s19, %s1852_s7  ;;  %s1944_s24 = smov [#allocation8]  }
  0x61   : > { %v1618_v13 = vld [vmem:[#allocation6 + $0x264] ss:$16 sps:$4 sm:$0xff]   ;;  %v1621_v15 = vld [vmem:[#allocation6 + $0x260] ss:$16 sps:$4 sm:$0xff]   ;;  %s1856_s22 = sshll.u32 %s1944_s24, 4  ;;  %s1857_s22 = int_to_ptr.vmem [resolvable:$false] %s1856_s22 }
  0x62   : > { %v1622_v16 = vld [vmem:[#allocation6 + $0x84] ss:$16 sps:$4 sm:$0xff]   ;;  %v1626_v18 = vld [vmem:[#allocation6 + $0x80] ss:$16 sps:$4 sm:$0xff]   ;;  %p1854_p6 = pnand %p1853_p4, %p2058_p10  ;;  %s1858_s27 = scalar_lea.vmem %s1857_s22, 512 }
  0x63   : > { %v1624_v17 = vld [vmem:[#allocation6 + $0x284] ss:$16 sps:$4 sm:$0xff]   ;;  %v1627_v19 = vld [vmem:[#allocation6 + $0x280] ss:$16 sps:$4 sm:$0xff]   ;;  %p1859_p12 = scmp.lt.s32.totalorder %s2144_s19, %s1857_s22  ;;  %p1860_p11 = scmp.lt.s32.totalorder %s1858_s27, %s1852_s7 }
  0x64   : > { %1017 = vmatpush1.bf16.xpose.msra.mxu0 %v1608_v6  ;;  %v1628_v20 = vld [vmem:[#allocation6 + $0xa4] ss:$16 sps:$4 sm:$0xff]   ;;  %v1632_v22 = vld [vmem:[#allocation6 + $0xa0] ss:$16 sps:$4 sm:$0xff]   ;;  %v1696_v6 = vld [vmem:[#allocation6 + $0x8] ss:$16 sps:$4 sm:$0xff]   ;;  %p1855_p8 = pneg %p1854_p6 }
  0x65   : > { %1099 = vmatpush1.bf16.xpose.msra.mxu1 %v1609_v7  ;;  %1018 = vmatprep.subr.bf16.mxu0 %v1610_v8  ;;  %v1630_v21 = vld [vmem:[#allocation6 + $0x2a4] ss:$16 sps:$4 sm:$0xff]   ;;  %v1633_v23 = vld [vmem:[#allocation6 + $0x2a0] ss:$16 sps:$4 sm:$0xff]   ;;  %v1699_v7 = vld [vmem:[#allocation6 + $0x208] ss:$16 sps:$4 sm:$0xff]   ;;  %p1861_p0 = por %p1860_p11, %p1859_p12 }
  0x66   : > { %1100 = vmatprep.subr.bf16.mxu1 %v1612_v9  ;;  %v1634_v24 = vld [vmem:[#allocation6 + $0xc4] ss:$16 sps:$4 sm:$0xff]   ;;  %v1638_v28 = vld [vmem:[#allocation6 + $0xc0] ss:$16 sps:$4 sm:$0xff]   ;;  %v1704_v8 = vld [vmem:[#allocation6 + $0x2c] ss:$16 sps:$4 sm:$0xff]  }
  0x67   : > { %v1636_v25 = vld [vmem:[#allocation6 + $0x2c4] ss:$16 sps:$4 sm:$0xff]   ;;  %v1639_v29 = vld [vmem:[#allocation6 + $0x2c0] ss:$16 sps:$4 sm:$0xff]   ;;  %v1707_v9 = vld [vmem:[#allocation6 + $0x22c] ss:$16 sps:$4 sm:$0xff]   ;;  %p1862_p5 = pnand %p1861_p0, %p1855_p8 }
  0x68   : > { %v2128_v26 = vld [vmem:[%s2117_s16] sm:$0xff] }
  0x69   : > { %v1361_v27 = vcombine.high %v2128_v26, %v2128_v26  ;;  %v1640_v30 = vld [vmem:[#allocation6 + $0xe4] ss:$16 sps:$4 sm:$0xff]   ;;  %v1644_v32 = vld [vmem:[#allocation6 + $0xe0] ss:$16 sps:$4 sm:$0xff]   ;;  %v1360_v4 = vcombine.low %v2128_v26, %v2128_v26  ;;  %v1731_v26 = vld [vmem:[#allocation6 + $0x2ac] ss:$16 sps:$4 sm:$0xff]  }
  0x6a   : > { %v1642_v31 = vld [vmem:[#allocation6 + $0x2e4] ss:$16 sps:$4 sm:$0xff]   ;;  %v1645_v33 = vld [vmem:[#allocation6 + $0x2e0] ss:$16 sps:$4 sm:$0xff]  }
  0x6b   : > { %1046 = vmatprep.mubr.bf16.mxu0 %v1361_v27  ;;  %1128 = vmatprep.mubr.bf16.mxu1 %v1361_v27  ;;  %v1646_v34 = vld [vmem:[#allocation6 + $0x104] ss:$16 sps:$4 sm:$0xff]   ;;  %v1650_v36 = vld [vmem:[#allocation6 + $0x100] ss:$16 sps:$4 sm:$0xff]   ;;  %v1726_v27 = vld [vmem:[#allocation6 + $0xa8] ss:$16 sps:$4 sm:$0xff]  }
  0x6c   : > { %1019 = vmatpush1.bf16.xpose.msra.mxu0 %v1614_v10  ;;  %v1648_v35 = vld [vmem:[#allocation6 + $0x304] ss:$16 sps:$4 sm:$0xff]   ;;  %v1651_v37 = vld [vmem:[#allocation6 + $0x300] ss:$16 sps:$4 sm:$0xff]   ;;  %v1363_v10 = vcombine.high %v2135_v5, %v2135_v5 }
  0x6d   : > { %1101 = vmatpush1.bf16.xpose.msra.mxu1 %v1615_v11  ;;  %1020 = vmatprep.subr.bf16.mxu0 %v1616_v12  ;;  %v1652_v38 = vld [vmem:[#allocation6 + $0x124] ss:$16 sps:$4 sm:$0xff]   ;;  %v1656_v40 = vld [vmem:[#allocation6 + $0x120] ss:$16 sps:$4 sm:$0xff]   ;;  %v1702_v11 = vld [vmem:[#allocation6 + $0x28] ss:$16 sps:$4 sm:$0xff]  }
  0x6e   : > { %1102 = vmatprep.subr.bf16.mxu1 %v1618_v13  ;;  %v1654_v39 = vld [vmem:[#allocation6 + $0x324] ss:$16 sps:$4 sm:$0xff]   ;;  %v1657_v41 = vld [vmem:[#allocation6 + $0x320] ss:$16 sps:$4 sm:$0xff]   ;;  %v1705_v12 = vld [vmem:[#allocation6 + $0x228] ss:$16 sps:$4 sm:$0xff]  }
  0x6f   : > { %v1658_v42 = vld [vmem:[#allocation6 + $0x144] ss:$16 sps:$4 sm:$0xff]   ;;  %v1662_v44 = vld [vmem:[#allocation6 + $0x140] ss:$16 sps:$4 sm:$0xff]   ;;  %v1710_v13 = vld [vmem:[#allocation6 + $0x4c] ss:$16 sps:$4 sm:$0xff]  }
  0x70   : > { %v1660_v43 = vld [vmem:[#allocation6 + $0x344] ss:$16 sps:$4 sm:$0xff]   ;;  %v1663_v45 = vld [vmem:[#allocation6 + $0x340] ss:$16 sps:$4 sm:$0xff]  }
  0x71   : > { %v1664_v46 = vld [vmem:[#allocation6 + $0x164] ss:$16 sps:$4 sm:$0xff]   ;;  %v1668_v48 = vld [vmem:[#allocation6 + $0x160] ss:$16 sps:$4 sm:$0xff]  }
  0x72   : > { %v1666_v47 = vld [vmem:[#allocation6 + $0x364] ss:$16 sps:$4 sm:$0xff]   ;;  %v1669_v49 = vld [vmem:[#allocation6 + $0x360] ss:$16 sps:$4 sm:$0xff]  }
  0x73   : > { %v1670_v50 = vld [vmem:[#allocation6 + $0x184] ss:$16 sps:$4 sm:$0xff]   ;;  %v1674_v52 = vld [vmem:[#allocation6 + $0x180] ss:$16 sps:$4 sm:$0xff]  }
  0x74   : > { %1021 = vmatpush1.bf16.xpose.msra.mxu0 %v1620_v14  ;;  %v1672_v51 = vld [vmem:[#allocation6 + $0x384] ss:$16 sps:$4 sm:$0xff]   ;;  %v1675_v53 = vld [vmem:[#allocation6 + $0x380] ss:$16 sps:$4 sm:$0xff]   ;;  %v1713_v14 = vld [vmem:[#allocation6 + $0x24c] ss:$16 sps:$4 sm:$0xff]  }
  0x75   : > { %1103 = vmatpush1.bf16.xpose.msra.mxu1 %v1621_v15  ;;  %1022 = vmatprep.subr.bf16.mxu0 %v1622_v16  ;;  %v1676_v54 = vld [vmem:[#allocation6 + $0x1a4] ss:$16 sps:$4 sm:$0xff]   ;;  %v1680_v56 = vld [vmem:[#allocation6 + $0x1a0] ss:$16 sps:$4 sm:$0xff]   ;;  %v1708_v15 = vld [vmem:[#allocation6 + $0x48] ss:$16 sps:$4 sm:$0xff]  }
  0x76   : > { %1104 = vmatprep.subr.bf16.mxu1 %v1624_v17  ;;  %v1678_v55 = vld [vmem:[#allocation6 + $0x3a4] ss:$16 sps:$4 sm:$0xff]   ;;  %v1681_v57 = vld [vmem:[#allocation6 + $0x3a0] ss:$16 sps:$4 sm:$0xff]   ;;  %v1711_v16 = vld [vmem:[#allocation6 + $0x248] ss:$16 sps:$4 sm:$0xff]  }
  0x77   : > { %v1682_v58 = vld [vmem:[#allocation6 + $0x1c4] ss:$16 sps:$4 sm:$0xff]   ;;  %v1686_v60 = vld [vmem:[#allocation6 + $0x1c0] ss:$16 sps:$4 sm:$0xff]   ;;  %v1716_v17 = vld [vmem:[#allocation6 + $0x6c] ss:$16 sps:$4 sm:$0xff]  }
  0x78   : > { %v1684_v59 = vld [vmem:[#allocation6 + $0x3c4] ss:$16 sps:$4 sm:$0xff]   ;;  %v1687_v61 = vld [vmem:[#allocation6 + $0x3c0] ss:$16 sps:$4 sm:$0xff]  }
  0x79   : > { %v1688_v62 = vld [vmem:[#allocation6 + $0x1e4] ss:$16 sps:$4 sm:$0xff]   ;;  %v1692_v0 = vld [vmem:[#allocation6 + $0x1e0] ss:$16 sps:$4 sm:$0xff]  }
  0x7a   : > { %v1690_v63 = vld [vmem:[#allocation6 + $0x3e4] ss:$16 sps:$4 sm:$0xff]   ;;  %v1693_v1 = vld [vmem:[#allocation6 + $0x3e0] ss:$16 sps:$4 sm:$0xff]  }
  0x7c   : > { %1023 = vmatpush1.bf16.xpose.msra.mxu0 %v1626_v18  ;;  %v1719_v18 = vld [vmem:[#allocation6 + $0x26c] ss:$16 sps:$4 sm:$0xff]  }
  0x7d   : > { %1105 = vmatpush1.bf16.xpose.msra.mxu1 %v1627_v19  ;;  %1024 = vmatprep.subr.bf16.mxu0 %v1628_v20  ;;  %v1714_v19 = vld [vmem:[#allocation6 + $0x68] ss:$16 sps:$4 sm:$0xff]  }
  0x7e   : > { %1106 = vmatprep.subr.bf16.mxu1 %v1630_v21  ;;  %v1717_v20 = vld [vmem:[#allocation6 + $0x268] ss:$16 sps:$4 sm:$0xff]   ;;  %v1722_v21 = vld [vmem:[#allocation6 + $0x8c] ss:$16 sps:$4 sm:$0xff]  }
  0x84   : > { %1025 = vmatpush1.bf16.xpose.msra.mxu0 %v1632_v22  ;;  %v1725_v22 = vld [vmem:[#allocation6 + $0x28c] ss:$16 sps:$4 sm:$0xff]  }
  0x85   : > { %1107 = vmatpush1.bf16.xpose.msra.mxu1 %v1633_v23  ;;  %1026 = vmatprep.subr.bf16.mxu0 %v1634_v24  ;;  %v1720_v23 = vld [vmem:[#allocation6 + $0x88] ss:$16 sps:$4 sm:$0xff]  }
  0x86   : > { %1108 = vmatprep.subr.bf16.mxu1 %v1636_v25  ;;  %v1723_v24 = vld [vmem:[#allocation6 + $0x288] ss:$16 sps:$4 sm:$0xff]   ;;  %v1728_v25 = vld [vmem:[#allocation6 + $0xac] ss:$16 sps:$4 sm:$0xff]  }
  0x8c   : > { %1027 = vmatpush1.bf16.xpose.msra.mxu0 %v1638_v28  ;;  %v1729_v28 = vld [vmem:[#allocation6 + $0x2a8] ss:$16 sps:$4 sm:$0xff]  }
  0x8d   : > { %1109 = vmatpush1.bf16.xpose.msra.mxu1 %v1639_v29  ;;  %1028 = vmatprep.subr.bf16.mxu0 %v1640_v30  ;;  %v1734_v29 = vld [vmem:[#allocation6 + $0xcc] ss:$16 sps:$4 sm:$0xff]  }
  0x8e   : > { %1110 = vmatprep.subr.bf16.mxu1 %v1642_v31  ;;  %v1737_v30 = vld [vmem:[#allocation6 + $0x2cc] ss:$16 sps:$4 sm:$0xff]   ;;  %v1732_v31 = vld [vmem:[#allocation6 + $0xc8] ss:$16 sps:$4 sm:$0xff]  }
  0x94   : > { %1029 = vmatpush1.bf16.xpose.msra.mxu0 %v1644_v32  ;;  %v1735_v32 = vld [vmem:[#allocation6 + $0x2c8] ss:$16 sps:$4 sm:$0xff]  }
  0x95   : > { %1111 = vmatpush1.bf16.xpose.msra.mxu1 %v1645_v33  ;;  %1030 = vmatprep.subr.bf16.mxu0 %v1646_v34  ;;  %v1740_v33 = vld [vmem:[#allocation6 + $0xec] ss:$16 sps:$4 sm:$0xff]  }
  0x96   : > { %1112 = vmatprep.subr.bf16.mxu1 %v1648_v35  ;;  %v1743_v34 = vld [vmem:[#allocation6 + $0x2ec] ss:$16 sps:$4 sm:$0xff]   ;;  %v1738_v35 = vld [vmem:[#allocation6 + $0xe8] ss:$16 sps:$4 sm:$0xff]  }
  0x9c   : > { %1031 = vmatpush1.bf16.xpose.msra.mxu0 %v1650_v36  ;;  %v1741_v36 = vld [vmem:[#allocation6 + $0x2e8] ss:$16 sps:$4 sm:$0xff]  }
  0x9d   : > { %1113 = vmatpush1.bf16.xpose.msra.mxu1 %v1651_v37  ;;  %1032 = vmatprep.subr.bf16.mxu0 %v1652_v38  ;;  %v1746_v37 = vld [vmem:[#allocation6 + $0x10c] ss:$16 sps:$4 sm:$0xff]  }
  0x9e   : > { %1114 = vmatprep.subr.bf16.mxu1 %v1654_v39  ;;  %v1749_v38 = vld [vmem:[#allocation6 + $0x30c] ss:$16 sps:$4 sm:$0xff]   ;;  %v1744_v39 = vld [vmem:[#allocation6 + $0x108] ss:$16 sps:$4 sm:$0xff]  }
  0xa4   : > { %1033 = vmatpush1.bf16.xpose.msra.mxu0 %v1656_v40  ;;  %v1747_v40 = vld [vmem:[#allocation6 + $0x308] ss:$16 sps:$4 sm:$0xff]  }
  0xa5   : > { %1115 = vmatpush1.bf16.xpose.msra.mxu1 %v1657_v41  ;;  %1034 = vmatprep.subr.bf16.mxu0 %v1658_v42  ;;  %v1752_v41 = vld [vmem:[#allocation6 + $0x12c] ss:$16 sps:$4 sm:$0xff]  }
  0xa6   : > { %1116 = vmatprep.subr.bf16.mxu1 %v1660_v43  ;;  %v1755_v42 = vld [vmem:[#allocation6 + $0x32c] ss:$16 sps:$4 sm:$0xff]   ;;  %v1750_v43 = vld [vmem:[#allocation6 + $0x128] ss:$16 sps:$4 sm:$0xff]  }
  0xac   : > { %1035 = vmatpush1.bf16.xpose.msra.mxu0 %v1662_v44  ;;  %v1753_v44 = vld [vmem:[#allocation6 + $0x328] ss:$16 sps:$4 sm:$0xff]  }
  0xad   : > { %1117 = vmatpush1.bf16.xpose.msra.mxu1 %v1663_v45  ;;  %1036 = vmatprep.subr.bf16.mxu0 %v1664_v46  ;;  %v1758_v45 = vld [vmem:[#allocation6 + $0x14c] ss:$16 sps:$4 sm:$0xff]  }
  0xae   : > { %1118 = vmatprep.subr.bf16.mxu1 %v1666_v47  ;;  %v1761_v46 = vld [vmem:[#allocation6 + $0x34c] ss:$16 sps:$4 sm:$0xff]   ;;  %v1756_v47 = vld [vmem:[#allocation6 + $0x148] ss:$16 sps:$4 sm:$0xff]  }
  0xb4   : > { %1037 = vmatpush1.bf16.xpose.msra.mxu0 %v1668_v48  ;;  %v1759_v48 = vld [vmem:[#allocation6 + $0x348] ss:$16 sps:$4 sm:$0xff]  }
  0xb5   : > { %1119 = vmatpush1.bf16.xpose.msra.mxu1 %v1669_v49  ;;  %1038 = vmatprep.subr.bf16.mxu0 %v1670_v50  ;;  %v1764_v49 = vld [vmem:[#allocation6 + $0x16c] ss:$16 sps:$4 sm:$0xff]  }
  0xb6   : > { %1120 = vmatprep.subr.bf16.mxu1 %v1672_v51  ;;  %v1767_v50 = vld [vmem:[#allocation6 + $0x36c] ss:$16 sps:$4 sm:$0xff]   ;;  %v1762_v51 = vld [vmem:[#allocation6 + $0x168] ss:$16 sps:$4 sm:$0xff]  }
  0xbc   : > { %1039 = vmatpush1.bf16.xpose.msra.mxu0 %v1674_v52  ;;  %v1765_v52 = vld [vmem:[#allocation6 + $0x368] ss:$16 sps:$4 sm:$0xff]  }
  0xbd   : > { %1121 = vmatpush1.bf16.xpose.msra.mxu1 %v1675_v53  ;;  %1040 = vmatprep.subr.bf16.mxu0 %v1676_v54  ;;  %v1770_v53 = vld [vmem:[#allocation6 + $0x18c] ss:$16 sps:$4 sm:$0xff]  }
  0xbe   : > { %1122 = vmatprep.subr.bf16.mxu1 %v1678_v55  ;;  %v1773_v54 = vld [vmem:[#allocation6 + $0x38c] ss:$16 sps:$4 sm:$0xff]   ;;  %v1768_v55 = vld [vmem:[#allocation6 + $0x188] ss:$16 sps:$4 sm:$0xff]  }
  0xc4   : > { %1041 = vmatpush1.bf16.xpose.msra.mxu0 %v1680_v56  ;;  %v1771_v56 = vld [vmem:[#allocation6 + $0x388] ss:$16 sps:$4 sm:$0xff]  }
  0xc5   : > { %1123 = vmatpush1.bf16.xpose.msra.mxu1 %v1681_v57  ;;  %1042 = vmatprep.subr.bf16.mxu0 %v1682_v58  ;;  %v1776_v57 = vld [vmem:[#allocation6 + $0x1ac] ss:$16 sps:$4 sm:$0xff]  }
  0xc6   : > { %1124 = vmatprep.subr.bf16.mxu1 %v1684_v59  ;;  %v1779_v58 = vld [vmem:[#allocation6 + $0x3ac] ss:$16 sps:$4 sm:$0xff]   ;;  %v1774_v59 = vld [vmem:[#allocation6 + $0x1a8] ss:$16 sps:$4 sm:$0xff]  }
  0xcc   : > { %1043 = vmatpush1.bf16.xpose.msra.mxu0 %v1686_v60  ;;  %v1777_v60 = vld [vmem:[#allocation6 + $0x3a8] ss:$16 sps:$4 sm:$0xff]  }
  0xcd   : > { %1125 = vmatpush1.bf16.xpose.msra.mxu1 %v1687_v61  ;;  %1044 = vmatprep.subr.bf16.mxu0 %v1688_v62  ;;  %v1782_v61 = vld [vmem:[#allocation6 + $0x1cc] ss:$16 sps:$4 sm:$0xff]  }
  0xce   : > { %1126 = vmatprep.subr.bf16.mxu1 %v1690_v63  ;;  %v1785_v62 = vld [vmem:[#allocation6 + $0x3cc] ss:$16 sps:$4 sm:$0xff]   ;;  %v1780_v63 = vld [vmem:[#allocation6 + $0x1c8] ss:$16 sps:$4 sm:$0xff]  }
  0xd4   : > { %1045 = vmatpush1.bf16.xpose.msra.mxu0 %v1692_v0  ;;  %v1783_v0 = vld [vmem:[#allocation6 + $0x3c8] ss:$16 sps:$4 sm:$0xff]  }
  0xd5   : > { %1127 = vmatpush1.bf16.xpose.msra.mxu1 %v1693_v1  ;;  %1055 = vmatprep.subr.bf16.mxu0 %v1698_v2  ;;  %v1788_v1 = vld [vmem:[#allocation6 + $0x1ec] ss:$16 sps:$4 sm:$0xff]  }
  0xd6   : > { %1137 = vmatprep.subr.bf16.mxu1 %v1701_v3  ;;  %v1791_v2 = vld [vmem:[#allocation6 + $0x3ec] ss:$16 sps:$4 sm:$0xff]   ;;  %v1786_v3 = vld [vmem:[#allocation6 + $0x1e8] ss:$16 sps:$4 sm:$0xff]  }
  0xdb   : > { %1047 = vmatmul.mubr.bf16.vlgmr.msra.gmra.mrb[0].mxu0 %v1360_v4 }
  0xdc   : > { %1129 = vmatmul.mubr.bf16.vlgmr.msra.gmra.mrb[0].mxu1 %v1360_v4  ;;  %1056 = vmatpush1.bf16.xpose.msra.mxu0 %v1696_v6  ;;  %v1789_v4 = vld [vmem:[#allocation6 + $0x3e8] ss:$16 sps:$4 sm:$0xff]   ;;  %v1362_v6 = vcombine.low %v2135_v5, %v2135_v5 }
  0xdd   : > { %1138 = vmatpush1.bf16.xpose.msra.mxu1 %v1699_v7  ;;  %1057 = vmatprep.subr.bf16.mxu0 %v1704_v8 }
  0xde   : > { %1139 = vmatprep.subr.bf16.mxu1 %v1707_v9  ;;  %1087 = vmatprep.mubr.bf16.mxu0 %v1363_v10 }
  0xdf   : > { %1169 = vmatprep.mubr.bf16.mxu1 %v1363_v10 }
  0xe4   : > { %1058 = vmatpush1.bf16.xpose.msra.mxu0 %v1702_v11 }
  0xe5   : > { %1140 = vmatpush1.bf16.xpose.msra.mxu1 %v1705_v12  ;;  %1059 = vmatprep.subr.bf16.mxu0 %v1710_v13 }
  0xe6   : > { %1141 = vmatprep.subr.bf16.mxu1 %v1713_v14 }
  0xec   : > { %1060 = vmatpush1.bf16.xpose.msra.mxu0 %v1708_v15 }
  0xed   : > { %1142 = vmatpush1.bf16.xpose.msra.mxu1 %v1711_v16  ;;  %1061 = vmatprep.subr.bf16.mxu0 %v1716_v17 }
  0xee   : > { %1143 = vmatprep.subr.bf16.mxu1 %v1719_v18 }
  0xf4   : > { %1062 = vmatpush1.bf16.xpose.msra.mxu0 %v1714_v19 }
  0xf5   : > { %1144 = vmatpush1.bf16.xpose.msra.mxu1 %v1717_v20  ;;  %1063 = vmatprep.subr.bf16.mxu0 %v1722_v21 }
  0xf6   : > { %1145 = vmatprep.subr.bf16.mxu1 %v1725_v22 }
  0xfc   : > { %1064 = vmatpush1.bf16.xpose.msra.mxu0 %v1720_v23 }
  0xfd   : > { %1146 = vmatpush1.bf16.xpose.msra.mxu1 %v1723_v24  ;;  %1065 = vmatprep.subr.bf16.mxu0 %v1728_v25 }
  0xfe   : > { %1147 = vmatprep.subr.bf16.mxu1 %v1731_v26 }
 0x104   : > { %1066 = vmatpush1.bf16.xpose.msra.mxu0 %v1726_v27 }
 0x105   : > { %1148 = vmatpush1.bf16.xpose.msra.mxu1 %v1729_v28  ;;  %1067 = vmatprep.subr.bf16.mxu0 %v1734_v29 }
 0x106   : > { %1149 = vmatprep.subr.bf16.mxu1 %v1737_v30 }
 0x10c   : > { %1068 = vmatpush1.bf16.xpose.msra.mxu0 %v1732_v31 }
 0x10d   : > { %1150 = vmatpush1.bf16.xpose.msra.mxu1 %v1735_v32  ;;  %1069 = vmatprep.subr.bf16.mxu0 %v1740_v33 }
 0x10e   : > { %1151 = vmatprep.subr.bf16.mxu1 %v1743_v34 }
 0x114   : > { %1070 = vmatpush1.bf16.xpose.msra.mxu0 %v1738_v35 }
 0x115   : > { %1152 = vmatpush1.bf16.xpose.msra.mxu1 %v1741_v36  ;;  %1071 = vmatprep.subr.bf16.mxu0 %v1746_v37 }
 0x116   : > { %1153 = vmatprep.subr.bf16.mxu1 %v1749_v38 }
 0x11c   : > { %1072 = vmatpush1.bf16.xpose.msra.mxu0 %v1744_v39 }
 0x11d   : > { %1154 = vmatpush1.bf16.xpose.msra.mxu1 %v1747_v40  ;;  %1073 = vmatprep.subr.bf16.mxu0 %v1752_v41 }
 0x11e   : > { %1155 = vmatprep.subr.bf16.mxu1 %v1755_v42 }
 0x124   : > { %1074 = vmatpush1.bf16.xpose.msra.mxu0 %v1750_v43 }
 0x125   : > { %1156 = vmatpush1.bf16.xpose.msra.mxu1 %v1753_v44  ;;  %1075 = vmatprep.subr.bf16.mxu0 %v1758_v45 }
 0x126   : > { %1157 = vmatprep.subr.bf16.mxu1 %v1761_v46 }
 0x12c   : > { %1076 = vmatpush1.bf16.xpose.msra.mxu0 %v1756_v47 }
 0x12d   : > { %1158 = vmatpush1.bf16.xpose.msra.mxu1 %v1759_v48  ;;  %1077 = vmatprep.subr.bf16.mxu0 %v1764_v49 }
 0x12e   : > { %1159 = vmatprep.subr.bf16.mxu1 %v1767_v50 }
 0x134   : > { %1078 = vmatpush1.bf16.xpose.msra.mxu0 %v1762_v51 }
 0x135   : > { %1160 = vmatpush1.bf16.xpose.msra.mxu1 %v1765_v52  ;;  %1079 = vmatprep.subr.bf16.mxu0 %v1770_v53 }
 0x136   : > { %1161 = vmatprep.subr.bf16.mxu1 %v1773_v54 }
 0x13c   : > { %1080 = vmatpush1.bf16.xpose.msra.mxu0 %v1768_v55 }
 0x13d   : > { %1162 = vmatpush1.bf16.xpose.msra.mxu1 %v1771_v56  ;;  %1081 = vmatprep.subr.bf16.mxu0 %v1776_v57 }
 0x13e   : > { %1163 = vmatprep.subr.bf16.mxu1 %v1779_v58 }
 0x144   : > { %1082 = vmatpush1.bf16.xpose.msra.mxu0 %v1774_v59 }
 0x145   : > { %1164 = vmatpush1.bf16.xpose.msra.mxu1 %v1777_v60  ;;  %1083 = vmatprep.subr.bf16.mxu0 %v1782_v61 }
 0x146   : > { %1165 = vmatprep.subr.bf16.mxu1 %v1785_v62 }
 0x14c   : > { %1084 = vmatpush1.bf16.xpose.msra.mxu0 %v1780_v63 }
 0x14d   : > { %1166 = vmatpush1.bf16.xpose.msra.mxu1 %v1783_v0  ;;  %1085 = vmatprep.subr.bf16.mxu0 %v1788_v1 }
 0x14e   : > { %1167 = vmatprep.subr.bf16.mxu1 %v1791_v2 }
 0x154   : > { %1086 = vmatpush1.bf16.xpose.msra.mxu0 %v1786_v3 }
 0x155   : > { %1168 = vmatpush1.bf16.xpose.msra.mxu1 %v1789_v4 }
 0x15b   : > { %1088 = vmatmul.mubr.bf16.vlgmr.msra.gmra.mrb[0].mxu0 %v1362_v6 }
 0x15c   : > { %1170 = vmatmul.mubr.bf16.vlgmr.msra.gmra.mrb[0].mxu1 %v1362_v6 }
 0x22e   : > { %v1089_v7 = vpop.f32.mrb[0].mxu0 }
 0x22f   : > { %v1171_v8 = vpop.f32.mrb[0].mxu1  ;;  %v1091_v9 = vpop.f32.mrb[1].mxu0 }
 0x230   : > { %v1173_v10 = vpop.f32.mrb[1].mxu1  ;;  %v1505_v5 = vpack.c.bf16 %v1091_v9, %v1089_v7  ;;  %v1093_v12 = vpop.f32.mrb[2].mxu0 }
 0x231   : > { %v1510_v11 = vpack.c.bf16 %v1173_v10, %v1171_v8  ;;  %v1175_v13 = vpop.f32.mrb[2].mxu1  ;;  %v1094_v14 = vpop.f32.mrb[3].mxu0 }
 0x232   : > { %v1176_v15 = vpop.f32.mrb[3].mxu1  ;;  %1506 = vst [vmem:[%s225_s17] sm:$0xff] %v1505_v5  }
 0x233   : > { %1512 = vst [vmem:[%s225_s17 + $0x8] sm:$0xff] %v1510_v11  }
 0x234   : > { %1865 = shalt.err (!%p1862_p5)
}
 0x235   : > { %s1866_s23 = scalar_lea.hbm %s2149_s6, 256  ;;  %s1870_s3 = scalar_lea.hbm %s2200_s2, 512 }
 0x236   : > { %p1867_p9 = scmp.ne.s32.totalorder %s2149_s6, %s1866_s23  ;;  %p1871_p7 = scmp.lt.u32.totalorder %s2149_s6, %s2200_s2 }
 0x237   : > { %p1872_p3 = scmp.lt.u32.totalorder %s1870_s3, %s1866_s23  ;;  %p1874_p4 = scmp.lt.u32.totalorder %s1866_s23, %s2149_s6 }
 0x238   : > { %p1868_p1 = pnand %p1867_p9, %p2058_p10 }
 0x239   : > { %p1873_p13 = por %p1872_p3, %p1871_p7 }
 0x23a   : > { %p1869_p2 = pneg %p1868_p1 }
 0x23b   : > { %p1875_p6 = por %p1874_p4, %p1873_p13 }
 0x23d   : > { %p1876_p8 = pnand %p1875_p6, %p1869_p2 }
 0x23f   : > { %1879 = shalt.err (!%p1876_p8)
}
 0x240   : > { %s1945_s16 = smov 64   ;;  %s1946_s17 = smov 4  }
 0x241   : > { %1527 = dma.vmem_to_hbm [thread:$0]  (%p2058_p10), %s2144_s19, 256, %s2149_s6, %s1221_s12, %s1945_s16, %s1945_s16, %s1946_s17  }
 0x242 PF: > { %s1252_s21 = sand.u32 1, %s1918_s9   ;;  %p2218_p12 = scmp.ne.s32.totalorder %s2208_s20, 0 }
 0x243   : > { %p2219_p11 = scmp.ge.s32.totalorder %s1938_s14, 2  ;;  %s1253_s4 = scalar_lea.sflag [#allocation5], %s1252_s21 }
 0x245   : > { %p1538_p0 = pnand %p2219_p11, %p2218_p12 }
 0x247   : > { %1913 = dma.done.wait (!%p1538_p0), %s1253_s4, 256  }
 0x248   : > { %1915 = vsyncadd (!%p1538_p0), %s1253_s4, 4294967040  ;;  %s19_s14 = sadd.s32 1, %s1938_s14   ;;  %s2220_s9 = smov %s1922_s10 }
 0x249   : > { %p16_p5 = scmp.ge.s32.totalorder %s19_s14, 4   ;;  %s2221_s10 = smov %s1926_s11 }
 0x24a   : > { %s2222_s11 = smov %s2067_s28  ;;  %s2223_s12 = smov %s1934_s13 }
 0x24b   : > { %s2224_s13 = smov %s2226_s25  ;;  %18 = sbr.rel (!%p16_p5) target bundleno = 7 (0x7), region = 93 }
 0x252   :  { %1258 = vsyncpa [#allocation4], 1 }
 0x253   :  { %1260 = vsyncpa [#allocation4 + $0x1], 1 }
 0x254   :  { %1261 = vsyncpa [#allocation7], 1 }
 0x255   :  { %1262 = vsyncpa [#allocation5], 1 }
 0x256   :  { %1264 = vsyncpa [#allocation5 + $0x1], 1 }

</bundles_post_ra>
